<compile_context>
chip_gen: v5e
topology: v5e:2x2
jax: 0.10.0
libtpu: 0.0.40
codegen_flags: <defaults>
</compile_context>

<pallas_src>
import functools

import jax
import jax.numpy as jnp
from jax.experimental import pallas as pl
from jax.experimental.pallas import tpu as pltpu

WEIGHT_CE = 1.0
WEIGHT_DICE = 1.0
SMOOTH = 1.0


def _dc_ce_kernel(x_ref, t_ref, tp_ref, den_ref, ce_ref, *, C, TS, S):
    """One grid step = one (batch element, spatial tile).

    x_ref  : (1, C, TS) float logits
    t_ref  : (1, 1, TS) int32 labels (padded region holds 0, masked below)
    tp_ref : (1, 1, C, 1) f32   -- per-class sum_s p*y  (tile partial)
    den_ref: (1, 1, C, 1) f32   -- per-class sum_s (p+y) = 2tp+fp+fn partial
    ce_ref : (1, 1, 1, 1) f32   -- sum over tile pixels of (lse - true_logit)
    """
    s_blk = pl.program_id(1)

    x = x_ref[0].astype(jnp.float32)          # (C, TS)
    t = t_ref[0]                              # (1, TS) int32

    # One-hot of the label map (scatter_ equivalent).
    # TODO(synk): labels outside [0, C) (e.g. an ignore value) give an all-zero
    # one-hot; module default ignore_label=None so this path is not needed.
    iota_c = jax.lax.broadcasted_iota(jnp.int32, (C, TS), 0)
    y = (iota_c == t).astype(jnp.float32)     # (C, TS)

    # Softmax over the channel axis (axis 0 of the tile).
    m = jnp.max(x, axis=0, keepdims=True)     # (1, TS)
    e = jnp.exp(x - m)                        # (C, TS)
    z = jnp.sum(e, axis=0, keepdims=True)     # (1, TS)
    r = pl.reciprocal(z, approx=False)        # EUP reciprocal, exact
    p = e * r                                 # softmax probs (C, TS)
    lse = m + jnp.log(z)                      # (1, TS) logsumexp

    # Validity mask column (handles spatial padding); folding the mask into
    # the dot RHS makes the masking multiplies free and moves the lane
    # reductions onto the (otherwise idle) MXU.
    pos = s_blk * TS + jax.lax.broadcasted_iota(jnp.int32, (TS, 1), 0)
    valid = (pos < S).astype(jnp.float32)     # (TS, 1)

    tp = jnp.dot(p * y, valid, preferred_element_type=jnp.float32)   # (C, 1)
    den = jnp.dot(p + y, valid, preferred_element_type=jnp.float32)  # (C, 1)
    tl = jnp.dot(x * y, valid, preferred_element_type=jnp.float32)   # (C, 1)
    lse_sum = jnp.dot(lse, valid, preferred_element_type=jnp.float32)  # (1,1)
    ce = lse_sum - jnp.sum(tl, axis=0, keepdims=True)                 # (1, 1)

    tp_ref[0, 0] = tp
    den_ref[0, 0] = den
    ce_ref[0, 0] = ce


def _round_up(v, m):
    return (v + m - 1) // m * m


def _pick_tile(S, C, logits_tile_bytes=1 << 20):
    """Spatial tile (lanes): multiple of 128, ~<=1 MiB of f32 logits per tile."""
    s_min = _round_up(S, 128)
    ts_cap = max(128, (logits_tile_bytes // (4 * max(C, 1))) // 128 * 128)
    # TODO(synk): for tiny H*W it would pay to also fold batch elements into
    # one grid step to amortize per-step pipeline overhead.
    return min(s_min, ts_cap)


def dc_and_ce_loss(net_output, target):
    """net_output: (B, C, H, W) float; target: (B, 1, H, W) label map."""
    B, C, H, W = net_output.shape
    S = H * W
    x = net_output.reshape(B, C, S)
    t = target.reshape(B, 1, S).astype(jnp.int32)

    TS = _pick_tile(S, C)
    S_pad = _round_up(S, TS)
    NS = S_pad // TS
    if S_pad != S:
        x = jnp.pad(x, ((0, 0), (0, 0), (0, S_pad - S)))
        t = jnp.pad(t, ((0, 0), (0, 0), (0, S_pad - S)))

    kernel = functools.partial(_dc_ce_kernel, C=C, TS=TS, S=S)

    # Double-buffered logits + labels tiles plus in-kernel (C, TS) temporaries.
    block_bytes = (C + 1) * TS * 4
    vmem_limit = int(min(40 * 1024 * 1024, max(24 * 1024 * 1024, 14 * block_bytes)))

    tp_out, den_out, ce_out = pl.pallas_call(
        kernel,
        out_shape=(
            jax.ShapeDtypeStruct((B, NS, C, 1), jnp.float32),
            jax.ShapeDtypeStruct((B, NS, C, 1), jnp.float32),
            jax.ShapeDtypeStruct((B, NS, 1, 1), jnp.float32),
        ),
        grid_spec=pltpu.PrefetchScalarGridSpec(
            num_scalar_prefetch=0,
            grid=(B, NS),
            in_specs=[
                pl.BlockSpec((1, C, TS), lambda b, s: (b, 0, s)),
                pl.BlockSpec((1, 1, TS), lambda b, s: (b, 0, s)),
            ],
            out_specs=[
                pl.BlockSpec((1, 1, C, 1), lambda b, s: (b, s, 0, 0)),
                pl.BlockSpec((1, 1, C, 1), lambda b, s: (b, s, 0, 0)),
                pl.BlockSpec((1, 1, 1, 1), lambda b, s: (b, s, 0, 0)),
            ],
        ),
        compiler_params=pltpu.CompilerParams(
            dimension_semantics=("parallel", "parallel"),
            vmem_limit_bytes=vmem_limit,
        ),
    )(x, t)

    # Tiny final combine in plain JAX (per-block partials -> loss scalar).
    tp = jnp.sum(tp_out[..., 0], axis=1)     # (B, C)
    den = jnp.sum(den_out[..., 0], axis=1)   # (B, C) = 2*tp + fp + fn
    dc = (2.0 * tp + SMOOTH) / (den + SMOOTH + 1e-8)
    dc_loss = -jnp.mean(dc)                  # batch_dice=False, do_bg=True
    ce_loss = jnp.sum(ce_out) / jnp.float32(B * S)   # CE 'mean' over true pixels
    return WEIGHT_CE * ce_loss + WEIGHT_DICE * dc_loss


def _reference_loss(net_output, target):
    """Plain-JAX reference mirroring the PyTorch forward (correctness check)."""
    B, C, H, W = net_output.shape
    labels = target[:, 0].astype(jnp.int32)                        # (B, H, W)
    p = jax.nn.softmax(net_output, axis=1)
    onehot = jax.nn.one_hot(labels, C, axis=1, dtype=jnp.float32)  # (B, C, H, W)
    tp = jnp.sum(p * onehot, axis=(2, 3))
    fp = jnp.sum(p * (1.0 - onehot), axis=(2, 3))
    fn = jnp.sum((1.0 - p) * onehot, axis=(2, 3))
    dc = (2.0 * tp + SMOOTH) / (2.0 * tp + fp + fn + SMOOTH + 1e-8)
    dc_loss = -jnp.mean(dc)
    logp = jax.nn.log_softmax(net_output, axis=1)
    ce_loss = -jnp.mean(jnp.sum(logp * onehot, axis=1))
    return WEIGHT_CE * ce_loss + WEIGHT_DICE * dc_loss


if __name__ == "__main__":
    key = jax.random.PRNGKey(0)

    # Case 1: lane-aligned spatial size.
    k1, k2, k3, k4 = jax.random.split(key, 4)
    B, C, H, W = 2, 4, 16, 16
    net_output = jax.random.normal(k1, (B, C, H, W), dtype=jnp.float32)
    target = jax.random.randint(k2, (B, 1, H, W), 0, C).astype(jnp.float32)

    loss = jax.block_until_ready(dc_and_ce_loss(net_output, target))
    ref = jax.block_until_ready(_reference_loss(net_output, target))
    if not jnp.allclose(loss, ref, rtol=1e-5, atol=1e-5):
        raise AssertionError(f"mismatch (aligned): kernel={loss} ref={ref}")

    # Case 2: spatial size not a multiple of 128 (exercises pad + mask path).
    B2, C2, H2, W2 = 2, 4, 10, 13
    net_output2 = jax.random.normal(k3, (B2, C2, H2, W2), dtype=jnp.float32)
    target2 = jax.random.randint(k4, (B2, 1, H2, W2), 0, C2).astype(jnp.float32)

    loss2 = jax.block_until_ready(dc_and_ce_loss(net_output2, target2))
    ref2 = jax.block_until_ready(_reference_loss(net_output2, target2))
    if not jnp.allclose(loss2, ref2, rtol=1e-5, atol=1e-5):
        raise AssertionError(f"mismatch (padded): kernel={loss2} ref={ref2}")

    print("KERNEL_OK")
</pallas_src>

<mosaic_0001>
module attributes {stable_mosaic.version = 11 : i64} {
  func.func @_dc_ce_kernel(%arg0: i32, %arg1: i32, %arg2: memref<1x4x256xf32, #tpu.memory_space<vmem>>, %arg3: memref<1x1x256xi32, #tpu.memory_space<vmem>>, %arg4: memref<1x1x4x1xf32, #tpu.memory_space<vmem>>, %arg5: memref<1x1x4x1xf32, #tpu.memory_space<vmem>>, %arg6: memref<1x1x1x1xf32, #tpu.memory_space<vmem>>) attributes {dimension_semantics = [#tpu.dimension_semantics<parallel>, #tpu.dimension_semantics<parallel>], iteration_bounds = array<i64: 2, 1>, scalar_prefetch = 0 : i64, scratch_operands = 0 : i64, tpu.core_type = #tpu.core_type<tc>, window_params = [{transform_indices = @transform_0, window_bounds = array<i64: 1, 4, 256>}, {transform_indices = @transform_1, window_bounds = array<i64: 1, 1, 256>}, {transform_indices = @transform_2, window_bounds = array<i64: 1, 1, 4, 1>}, {transform_indices = @transform_3, window_bounds = array<i64: 1, 1, 4, 1>}, {transform_indices = @transform_4, window_bounds = array<i64: 1, 1, 1, 1>}]} {
    %c0 = arith.constant 0 : index
    %c0_0 = arith.constant 0 : index
    %c0_1 = arith.constant 0 : index
    %0 = vector.load %arg2[%c0, %c0_0, %c0_1] : memref<1x4x256xf32, #tpu.memory_space<vmem>>, vector<1x4x256xf32>
    %1 = vector.shape_cast %0 : vector<1x4x256xf32> to vector<4x256xf32>
    %c0_2 = arith.constant 0 : index
    %c0_3 = arith.constant 0 : index
    %c0_4 = arith.constant 0 : index
    %2 = vector.load %arg3[%c0_2, %c0_3, %c0_4] : memref<1x1x256xi32, #tpu.memory_space<vmem>>, vector<1x1x256xi32>
    %3 = vector.shape_cast %2 : vector<1x1x256xi32> to vector<1x256xi32>
    %4 = tpu.iota {dimensions = array<i32: 0>} : vector<4x256xi32>
    %5 = vector.broadcast %3 : vector<1x256xi32> to vector<4x256xi32>
    %6 = arith.cmpi eq, %4, %5 : vector<4x256xi32>
    %7 = arith.extui %6 : vector<4x256xi1> to vector<4x256xi32>
    %8 = arith.sitofp %7 : vector<4x256xi32> to vector<4x256xf32>
    %cst = arith.constant dense<0xFF800000> : vector<256xf32>
    %9 = vector.multi_reduction <maximumf>, %1, %cst [0] : vector<4x256xf32> to vector<256xf32>
    %10 = vector.shape_cast %9 : vector<256xf32> to vector<1x256xf32>
    %11 = vector.broadcast %10 : vector<1x256xf32> to vector<4x256xf32>
    %12 = arith.subf %1, %11 : vector<4x256xf32>
    %13 = math.exp %12 : vector<4x256xf32>
    %cst_5 = arith.constant dense<0.000000e+00> : vector<256xf32>
    %14 = vector.multi_reduction <add>, %13, %cst_5 [0] : vector<4x256xf32> to vector<256xf32>
    %15 = vector.shape_cast %14 : vector<256xf32> to vector<1x256xf32>
    %16 = tpu.reciprocal %15 : vector<1x256xf32> -> vector<1x256xf32>
    %17 = vector.broadcast %16 : vector<1x256xf32> to vector<4x256xf32>
    %18 = arith.mulf %13, %17 : vector<4x256xf32>
    %19 = math.log %15 : vector<1x256xf32>
    %20 = arith.addf %10, %19 : vector<1x256xf32>
    %c256_i32 = arith.constant 256 : i32
    %21 = arith.muli %arg1, %c256_i32 : i32
    %22 = tpu.iota {dimensions = array<i32: 0>} : vector<256x1xi32>
    %23 = vector.broadcast %21 : i32 to vector<256x1xi32>
    %24 = arith.addi %23, %22 : vector<256x1xi32>
    %c256_i32_6 = arith.constant 256 : i32
    %25 = vector.broadcast %c256_i32_6 : i32 to vector<256x1xi32>
    %26 = arith.cmpi slt, %24, %25 : vector<256x1xi32>
    %27 = arith.extui %26 : vector<256x1xi1> to vector<256x1xi32>
    %28 = arith.sitofp %27 : vector<256x1xi32> to vector<256x1xf32>
    %29 = arith.mulf %18, %8 : vector<4x256xf32>
    %cst_7 = arith.constant dense<0.000000e+00> : vector<4x1xf32>
    %30 = tpu.matmul %29, %28, %cst_7 {dimension_numbers = #tpu.dot_dimension_numbers<[1], [0], [0], [1], [0, 0, 1, 1], [], []>} : vector<4x256xf32>, vector<256x1xf32>, vector<4x1xf32> -> vector<4x1xf32>
    %31 = arith.addf %18, %8 : vector<4x256xf32>
    %cst_8 = arith.constant dense<0.000000e+00> : vector<4x1xf32>
    %32 = tpu.matmul %31, %28, %cst_8 {dimension_numbers = #tpu.dot_dimension_numbers<[1], [0], [0], [1], [0, 0, 1, 1], [], []>} : vector<4x256xf32>, vector<256x1xf32>, vector<4x1xf32> -> vector<4x1xf32>
    %33 = arith.mulf %1, %8 : vector<4x256xf32>
    %cst_9 = arith.constant dense<0.000000e+00> : vector<4x1xf32>
    %34 = tpu.matmul %33, %28, %cst_9 {dimension_numbers = #tpu.dot_dimension_numbers<[1], [0], [0], [1], [0, 0, 1, 1], [], []>} : vector<4x256xf32>, vector<256x1xf32>, vector<4x1xf32> -> vector<4x1xf32>
    %cst_10 = arith.constant dense<0.000000e+00> : vector<1x1xf32>
    %35 = tpu.matmul %20, %28, %cst_10 {dimension_numbers = #tpu.dot_dimension_numbers<[1], [0], [0], [1], [0, 0, 1, 1], [], []>} : vector<1x256xf32>, vector<256x1xf32>, vector<1x1xf32> -> vector<1x1xf32>
    %cst_11 = arith.constant dense<0.000000e+00> : vector<1xf32>
    %36 = vector.multi_reduction <add>, %34, %cst_11 [0] : vector<4x1xf32> to vector<1xf32>
    %37 = vector.shape_cast %36 : vector<1xf32> to vector<1x1xf32>
    %38 = arith.subf %35, %37 : vector<1x1xf32>
    %c0_12 = arith.constant 0 : index
    %c0_13 = arith.constant 0 : index
    %c0_14 = arith.constant 0 : index
    %c0_15 = arith.constant 0 : index
    %39 = vector.load %arg4[%c0_12, %c0_13, %c0_14, %c0_15] : memref<1x1x4x1xf32, #tpu.memory_space<vmem>>, vector<1x1x4x1xf32>
    %40 = vector.shape_cast %39 : vector<1x1x4x1xf32> to vector<4x1xf32>
    %41 = vector.shape_cast %30 : vector<4x1xf32> to vector<1x1x4x1xf32>
    tpu.vector_store %arg4[%c0_12, %c0_13, %c0_14, %c0_15], %41 {strides = array<i32>} : memref<1x1x4x1xf32, #tpu.memory_space<vmem>>, vector<1x1x4x1xf32>,
    %c0_16 = arith.constant 0 : index
    %c0_17 = arith.constant 0 : index
    %c0_18 = arith.constant 0 : index
    %c0_19 = arith.constant 0 : index
    %42 = vector.load %arg5[%c0_16, %c0_17, %c0_18, %c0_19] : memref<1x1x4x1xf32, #tpu.memory_space<vmem>>, vector<1x1x4x1xf32>
    %43 = vector.shape_cast %42 : vector<1x1x4x1xf32> to vector<4x1xf32>
    %44 = vector.shape_cast %32 : vector<4x1xf32> to vector<1x1x4x1xf32>
    tpu.vector_store %arg5[%c0_16, %c0_17, %c0_18, %c0_19], %44 {strides = array<i32>} : memref<1x1x4x1xf32, #tpu.memory_space<vmem>>, vector<1x1x4x1xf32>,
    %c0_20 = arith.constant 0 : index
    %c0_21 = arith.constant 0 : index
    %c0_22 = arith.constant 0 : index
    %c0_23 = arith.constant 0 : index
    %45 = vector.load %arg6[%c0_20, %c0_21, %c0_22, %c0_23] : memref<1x1x1x1xf32, #tpu.memory_space<vmem>>, vector<1x1x1x1xf32>
    %46 = vector.shape_cast %45 : vector<1x1x1x1xf32> to vector<1x1xf32>
    %47 = vector.shape_cast %38 : vector<1x1xf32> to vector<1x1x1x1xf32>
    tpu.vector_store %arg6[%c0_20, %c0_21, %c0_22, %c0_23], %47 {strides = array<i32>} : memref<1x1x1x1xf32, #tpu.memory_space<vmem>>, vector<1x1x1x1xf32>,
    return
  }
  func.func @transform_0(%arg0: i32, %arg1: i32) -> (i32, i32, i32) {
    %c0_i32 = arith.constant 0 : i32
    %c0_i32_0 = arith.constant 0 : i32
    return %arg0, %c0_i32, %arg1 : i32, i32, i32
  }
  func.func @transform_1(%arg0: i32, %arg1: i32) -> (i32, i32, i32) {
    %c0_i32 = arith.constant 0 : i32
    %c0_i32_0 = arith.constant 0 : i32
    return %arg0, %c0_i32, %arg1 : i32, i32, i32
  }
  func.func @transform_2(%arg0: i32, %arg1: i32) -> (i32, i32, i32, i32) {
    %c0_i32 = arith.constant 0 : i32
    %c0_i32_0 = arith.constant 0 : i32
    %c0_i32_1 = arith.constant 0 : i32
    return %arg0, %arg1, %c0_i32, %c0_i32_0 : i32, i32, i32, i32
  }
  func.func @transform_3(%arg0: i32, %arg1: i32) -> (i32, i32, i32, i32) {
    %c0_i32 = arith.constant 0 : i32
    %c0_i32_0 = arith.constant 0 : i32
    %c0_i32_1 = arith.constant 0 : i32
    return %arg0, %arg1, %c0_i32, %c0_i32_0 : i32, i32, i32, i32
  }
  func.func @transform_4(%arg0: i32, %arg1: i32) -> (i32, i32, i32, i32) {
    %c0_i32 = arith.constant 0 : i32
    %c0_i32_0 = arith.constant 0 : i32
    %c0_i32_1 = arith.constant 0 : i32
    return %arg0, %arg1, %c0_i32, %c0_i32_0 : i32, i32, i32, i32
  }
}

</mosaic_0001>

<bundles_post_ra>
// kernel: tpu_custom_call.1
= control target key start
LH: loop header
LB: loop body
LE: loop exit
PB: predicated region body
PF: predicated region fallthrough
CT: control target
= control target key end

     0   :  { %10 = vsyncpa [#allocation3], 0  ;;  %s1483_s0 = inlined_call_operand.hbm [shape: f32[2,4,256], index: 0, kind: input, shape index: {}]   ;;  %s1484_s1 = inlined_call_operand.hbm [shape: s32[2,1,256], index: 1, kind: input, shape index: {}]   ;;  %s1485_s2 = inlined_call_operand.vmem [shape: f32[2,1,4,1], index: 2, kind: output, shape index: {0}]   ;;  %s1486_s3 = inlined_call_operand.vmem [shape: f32[2,1,4,1], index: 3, kind: output, shape index: {1}]   ;;  %s1487_s4 = inlined_call_operand.vmem [shape: f32[2,1,1,1], index: 4, kind: output, shape index: {2}]  }
   0x1   :  { %12 = vsyncpa [#allocation3 + $0x1], 0 }
   0x2   :  { %13 = vsyncpa [#allocation5], 0 }
   0x3   :  { %15 = vsyncpa [#allocation5 + $0x1], 0  ;;  %s1202_s15 = smov 0   ;;  %s1204_s16 = smov 0  }
   0x4   :  { %s1206_s17 = smov 0   ;;  %s1208_s18 = smov 0  }
   0x5   :  { %s1210_s19 = smov 0   ;;  %s1212_s20 = smov 0  }
   0x6 LB: > { %s968_s21 = sadd.s32 4294967295, %s1173_s20   ;;  %s33_s22 = sadd.s32 1, %s1169_s19  ;;  %s1173_s20 = sphi %s1212_s20, %s21_s20   ;;  %s1169_s19 = sphi %s1210_s19, %s1499_s19   ;;  %s1165_s18 = sphi %s1208_s18, %s1498_s18   ;;  %s1161_s17 = sphi %s1206_s17, %s1497_s17   ;;  %s1157_s16 = sphi %s1204_s16, %s1496_s16   ;;  %s1153_s15 = sphi %s1202_s15, %s1495_s15  }
   0x7   : > { %p35_p0 = scmp.ge.s32.totalorder %s33_s22, 2  ;;  %s42_s23 = sadd.s32 1, %s1161_s17 }
   0x8   : > { %p49_p1 = scmp.ne.s32.totalorder %s1161_s17, %s1157_s16  ;;  %p50_p2 = scmp.eq.s32.totalorder %s1173_s20, 0 }
   0x9   : > { %s1501_s22 = smov (%p35_p0, %s33_s22), 0  ;;  %p55_p4 = scmp.ne.s32.totalorder %s1157_s16, %s1153_s15 }
   0xa   : > { %p1238_p3 = por %p50_p2, %p49_p1  ;;  %s37_s25 = ssub.s32 %s1169_s19, %s1501_s22 }
   0xb   : > { %p56_p5 = scmp.eq.s32.totalorder %s968_s21, 0  ;;  %p40_p6 = scmp.eq.s32.totalorder %s37_s25, 0 }
   0xc   : > { %p998_p8 = scmp.lt.s32.totalorder %s1173_s20, 2  ;;  %s191_s28 = sand.u32 1, %s1161_s17  }
   0xd   : > { %p1245_p7 = por %p56_p5, %p55_p4  ;;  %s986_s29 = sshll.u32 %s1169_s19, 3 }
   0xe   : > { %s1251_s27 = scalar_select %p40_p6, %s1161_s17, %s42_s23  }
   0xf   : > { %s972_s30 = sshll.u32 %s191_s28, 3  ;;  %s202_s7 = scalar_lea.hbm %s1483_s0, %s986_s29 }
  0x10   : > { %s204_s8 = sshll.u32 %s202_s7, 4  ;;  %s195_s9 = scalar_lea.vmem [#allocation2], %s972_s30  ;;  %s205_s8 = int_to_ptr.hbm [resolvable:$true] %s204_s8 }
  0x11   : > { %s206_s10 = sshll.u32 %s195_s9, 4  ;;  %p1260_p9 = pnand %p998_p8, %p1238_p3  ;;  %s207_s10 = int_to_ptr.vmem [resolvable:$true] %s206_s10 }
  0x12   : > { %p977_p10 = scmp.ge.s32.totalorder %s1173_s20, 1  ;;  %p232_p11 = scmp.lt.s32.totalorder %s1173_s20, 3 }
  0x13   : > { %s975_s12 = sshll.u32 %s191_s28, 1  ;;  %s192_s13 = scalar_lea.sflag [#allocation3], %s191_s28 }
  0x14   : > { %994 = dma.hbm_to_vmem [thread:$0]  (!%p1260_p9), %s205_s8, 128, %s207_s10, %s192_s13  }
  0x15   : > { %p233_p12 = pnand %p977_p10, %p232_p11  ;;  %s976_s14 = sshll.u32 %s1169_s19, 1 }
  0x16   : > { %s217_s15 = scalar_lea.vmem [#allocation4], %s975_s12  ;;  %s223_s24 = scalar_lea.hbm %s1484_s1, %s976_s14 }
  0x17   : > { %s227_s21 = sshll.u32 %s217_s15, 4  ;;  %s225_s29 = sshll.u32 %s223_s24, 4  ;;  %s228_s21 = int_to_ptr.vmem [resolvable:$true] %s227_s21  ;;  %s226_s29 = int_to_ptr.hbm [resolvable:$true] %s225_s29 }
  0x18   : > { %s214_s30 = scalar_lea.sflag [#allocation5], %s191_s28  ;;  %236 = sbr.rel (%p233_p12) target bundleno = 283 (0x11b), region = 28 }
  0x19   : > { %997 = dma.hbm_to_vmem [thread:$0]  (!%p1260_p9), %s226_s29, 32, %s228_s21, %s214_s30  }
  0x1a   : > { %s238_s5 = sand.u32 (!%p233_p12), 1, %s1157_s16  }
  0x1b   : > { %s978_s6 = sshll.u32 (!%p233_p12), %s238_s5, 3  ;;  %s239_s7 = scalar_lea.sflag (!%p233_p12), [#allocation3], %s238_s5 }
  0x1c   : > { %s242_s8 = scalar_lea.vmem (!%p233_p12), [#allocation2], %s978_s6 }
  0x1d   : > { %1144 = dma.done.wait (%p1245_p7), %s239_s7, 128  }
  0x1e   : > { %1146 = vsyncadd (%p1245_p7), %s239_s7, 4294967168  ;;  %s979_s9 = sshll.u32 %s238_s5, 1  ;;  %s249_s10 = scalar_lea.sflag [#allocation5], %s238_s5 }
  0x1f   : > { %s1279_s12 = scalar_lea.vmem [#allocation4], %s979_s9 }
  0x20   : > { %1148 = dma.done.wait (%p1245_p7), %s249_s10, 32  }
  0x21   : > { %1150 = vsyncadd (%p1245_p7), %s249_s10, 4294967264  ;;  %v1175_v0 = vmov 1.0   ;;  %v1299_v1 = vld [vmem:[%s242_s8] sm:$0xff]  ;;  %vm338_vm0 = vcmask 1043456   ;;  %v322_v39 = vlaneseq  ;;  %v321_v40 = vld [vmem:[%s1279_s12] sm:$0x3] }
  0x22   : > { %594 = vmatpush.msra.mxu0 %v1175_v0  ;;  %614 = vmatpush.msra.mxu1 %v1175_v0  ;;  %333 = vst [vmem:[#allocation1] ss:$2 sm:$0xff] %v1299_v1  ;;  %v325_v42 = vperm.slane %v321_v40, 1  ;;  %v324_v45 = vperm.slane %v321_v40, 0  ;;  %v1176_v58 = vmov 0.0   ;;  %p300_p13 = scmp.lt.s32.totalorder %s1165_s18, 1 }
  0x23   : > { %641 = vmatpush.msra.mxu2 %v1175_v0  ;;  %661 = vmatpush.msra.mxu3 %v1175_v0  ;;  %v323_v41 = vshrl.u32 %v322_v39, 7  ;;  %vm768_vm11 = vcmask 3072   ;;  %vm779_vm12 = vcmask 0  }
  0x24   : > { %595 = vmatpush.msra.mxu0 %v1175_v0  ;;  %615 = vmatpush.msra.mxu1 %v1175_v0  ;;  %s1503_s18 = smov (!%p300_p13, %s1165_s18), 1 }
  0x25   : > { %642 = vmatpush.msra.mxu2 %v1175_v0  ;;  %662 = vmatpush.msra.mxu3 %v1175_v0  ;;  %vm1432_vm1 = vcmp.eq.s32.totalorder %v323_v41, %v325_v42  ;;  %vm326_vm8 = vcmp.eq.s32.totalorder %v323_v41, %v324_v45  ;;  %s980_s26 = sshll.u32 %s1503_s18, 2  ;;  %s319_s24 = scalar_lea.vmem %s1487_s4, %s1503_s18 }
  0x26   : > { %596 = vmatpush.msra.mxu0 %v1175_v0  ;;  %616 = vmatpush.msra.mxu1 %v1175_v0  ;;  %v983_v59 = vsel %vm1432_vm1, 1.0, %v1176_v58  ;;  %s306_s13 = scalar_lea.vmem %s1485_s2, %s980_s26  ;;  %s313_s21 = scalar_lea.vmem %s1486_s3, %s980_s26 }
  0x27   : > { %643 = vmatpush.msra.mxu2 %v1175_v0  ;;  %663 = vmatpush.msra.mxu3 %v1175_v0 }
  0x28   : > { %597 = vmatpush.msra.mxu0 %v1175_v0  ;;  %617 = vmatpush.msra.mxu1 %v1175_v0 }
  0x29   : > { %644 = vmatpush.msra.mxu2 %v1175_v0  ;;  %664 = vmatpush.msra.mxu3 %v1175_v0  ;;  %v334_v2 = vld.sshfl [vmem:[#allocation1] sm:$0xff pattern:$0x75316420]  ;;  %v335_v3 = vld.sshfl [vmem:[#allocation1 + $0x8] sm:$0xff pattern:$0x75316420] }
  0x2a   : > { %598 = vmatpush.msra.mxu0 %v1175_v0  ;;  %618 = vmatpush.msra.mxu1 %v1175_v0  ;;  %v339_v4 = vsel %vm338_vm0, %v334_v2, -inf  ;;  %v346_v5 = vsel %vm338_vm0, %v335_v3, -inf  ;;  %v584_v3 = vrot.slane %v983_v59, 4 }
  0x2b   : > { %645 = vmatpush.msra.mxu2 %v1175_v0  ;;  %665 = vmatpush.msra.mxu3 %v1175_v0  ;;  %v340_v6 = vrot.slane %v339_v4, 4  ;;  %v347_v7 = vrot.slane %v346_v5, 4 }
  0x2c   : > { %599 = vmatpush.msra.mxu0 %v1175_v0  ;;  %619 = vmatpush.msra.mxu1 %v1175_v0 }
  0x2d   : > { %646 = vmatpush.msra.mxu2 %v1175_v0  ;;  %666 = vmatpush.msra.mxu3 %v1175_v0  ;;  %v341_v8 = vmax.f32 %v339_v4, %v340_v6  ;;  %v348_v9 = vmax.f32 %v346_v5, %v347_v7  ;;  %v982_v4 = vsel %vm326_vm8, 1.0, %v1176_v58 }
  0x2e   : > { %600 = vmatpush.msra.mxu0 %v1175_v0  ;;  %620 = vmatpush.msra.mxu1 %v1175_v0 }
  0x2f   : > { %647 = vmatpush.msra.mxu2 %v1175_v0  ;;  %667 = vmatpush.msra.mxu3 %v1175_v0  ;;  %v342_v10 = vrot.slane %v341_v8, 2  ;;  %v349_v11 = vrot.slane %v348_v9, 2 }
  0x30   : > { %601 = vmatpush.msra.mxu0 %v1175_v0  ;;  %621 = vmatpush.msra.mxu1 %v1175_v0 }
  0x31   : > { %648 = vmatpush.msra.mxu2 %v1175_v0  ;;  %668 = vmatpush.msra.mxu3 %v1175_v0  ;;  %v343_v12 = vmax.f32 %v341_v8, %v342_v10  ;;  %v350_v13 = vmax.f32 %v348_v9, %v349_v11  ;;  %v585_v9 = vsel %vm338_vm0, %v982_v4, %v584_v3 }
  0x32   : > { %602 = vmatpush.msra.mxu0 %v1175_v0  ;;  %622 = vmatpush.msra.mxu1 %v1175_v0 }
  0x33   : > { %649 = vmatpush.msra.mxu2 %v1175_v0  ;;  %669 = vmatpush.msra.mxu3 %v1175_v0  ;;  %v344_v14 = vrot.slane %v343_v12, 1  ;;  %v351_v15 = vrot.slane %v350_v13, 1 }
  0x34   : > { %603 = vmatpush.msra.mxu0 %v1175_v0  ;;  %623 = vmatpush.msra.mxu1 %v1175_v0 }
  0x35   : > { %650 = vmatpush.msra.mxu2 %v1175_v0  ;;  %670 = vmatpush.msra.mxu3 %v1175_v0  ;;  %v1344_v16 = vmax.f32 %v343_v12, %v344_v14  ;;  %v1346_v17 = vmax.f32 %v350_v13, %v351_v15  ;;  %v681_v15 = vmul.f32 %v585_v9, %v1299_v1 }
  0x36   : > { %604 = vmatpush.msra.mxu0 %v1175_v0  ;;  %624 = vmatpush.msra.mxu1 %v1175_v0 }
  0x37   : > { %651 = vmatpush.msra.mxu2 %v1175_v0  ;;  %671 = vmatpush.msra.mxu3 %v1175_v0  ;;  %v355_v18 = vrot.slane %v1346_v17, 4 }
  0x38   : > { %605 = vmatpush.msra.mxu0 %v1175_v0  ;;  %625 = vmatpush.msra.mxu1 %v1175_v0 }
  0x39   : > { %652 = vmatpush.msra.mxu2 %v1175_v0  ;;  %672 = vmatpush.msra.mxu3 %v1175_v0  ;;  %v356_v19 = vsel %vm338_vm0, %v1344_v16, %v355_v18 }
  0x3a   : > { %606 = vmatpush.msra.mxu0 %v1175_v0  ;;  %626 = vmatpush.msra.mxu1 %v1175_v0  ;;  %v358_v20 = vsub.f32 %v1299_v1, %v356_v19 }
  0x3b   : > { %653 = vmatpush.msra.mxu2 %v1175_v0  ;;  %673 = vmatpush.msra.mxu3 %v1175_v0 }
  0x3c   : > { %607 = vmatpush.msra.mxu0 %v1175_v0  ;;  %627 = vmatpush.msra.mxu1 %v1175_v0  ;;  %v359_v21 = vmul.f32 1.442695, %v358_v20 }
  0x3d   : > { %654 = vmatpush.msra.mxu2 %v1175_v0  ;;  %674 = vmatpush.msra.mxu3 %v1175_v0 }
  0x3e   : > { %608 = vmatpush.msra.mxu0 %v1175_v0  ;;  %628 = vmatpush.msra.mxu1 %v1175_v0  ;;  %1049 = vpow2.f32 %v359_v21 }
  0x3f   : > { %655 = vmatpush.msra.mxu2 %v1175_v0  ;;  %675 = vmatpush.msra.mxu3 %v1175_v0 }
  0x40   : > { %609 = vmatpush.msra.mxu0 %v1175_v0  ;;  %629 = vmatpush.msra.mxu1 %v1175_v0 }
  0x41   : > { %656 = vmatpush.msra.mxu2 %v1175_v0  ;;  %676 = vmatpush.msra.mxu3 %v1175_v0 }
  0x42   : > { %688 = vmatpush.msrb.mxu0 %v1175_v0  ;;  %708 = vmatpush.msrb.mxu1 %v1175_v0 }
  0x43   : > { %728 = vmatpush.msrb.mxu2 %v1175_v0  ;;  %748 = vmatpush.msrb.mxu3 %v1175_v0 }
  0x44   : > { %689 = vmatpush.msrb.mxu0 %v1175_v0  ;;  %709 = vmatpush.msrb.mxu1 %v1175_v0  ;;  %v1380_v22 = vpop.eup %1049 }
  0x45   : > { %729 = vmatpush.msrb.mxu2 %v1175_v0  ;;  %749 = vmatpush.msrb.mxu3 %v1175_v0  ;;  %362 = vst [vmem:[#allocation1] ss:$2 sm:$0xff] %v1380_v22 }
  0x46   : > { %690 = vmatpush.msrb.mxu0 %v1175_v0  ;;  %710 = vmatpush.msrb.mxu1 %v1175_v0 }
  0x47   : > { %730 = vmatpush.msrb.mxu2 %v1175_v0  ;;  %750 = vmatpush.msrb.mxu3 %v1175_v0 }
  0x48   : > { %691 = vmatpush.msrb.mxu0 %v1175_v0  ;;  %711 = vmatpush.msrb.mxu1 %v1175_v0 }
  0x49   : > { %731 = vmatpush.msrb.mxu2 %v1175_v0  ;;  %751 = vmatpush.msrb.mxu3 %v1175_v0 }
  0x4a   : > { %692 = vmatpush.msrb.mxu0 %v1175_v0  ;;  %712 = vmatpush.msrb.mxu1 %v1175_v0 }
  0x4b   : > { %732 = vmatpush.msrb.mxu2 %v1175_v0  ;;  %752 = vmatpush.msrb.mxu3 %v1175_v0 }
  0x4c   : > { %693 = vmatpush.msrb.mxu0 %v1175_v0  ;;  %713 = vmatpush.msrb.mxu1 %v1175_v0  ;;  %v363_v23 = vld.sshfl [vmem:[#allocation1] sm:$0xff pattern:$0x75316420]  ;;  %v364_v24 = vld.sshfl [vmem:[#allocation1 + $0x8] sm:$0xff pattern:$0x75316420] }
  0x4d   : > { %733 = vmatpush.msrb.mxu2 %v1175_v0  ;;  %753 = vmatpush.msrb.mxu3 %v1175_v0  ;;  %v367_v25 = vsel %vm338_vm0, %v363_v23, 0.0  ;;  %v374_v26 = vsel %vm338_vm0, %v364_v24, 0.0 }
  0x4e   : > { %694 = vmatpush.msrb.mxu0 %v1175_v0  ;;  %714 = vmatpush.msrb.mxu1 %v1175_v0  ;;  %v368_v27 = vrot.slane %v367_v25, 4  ;;  %v375_v28 = vrot.slane %v374_v26, 4 }
  0x4f   : > { %734 = vmatpush.msrb.mxu2 %v1175_v0  ;;  %754 = vmatpush.msrb.mxu3 %v1175_v0 }
  0x50   : > { %695 = vmatpush.msrb.mxu0 %v1175_v0  ;;  %715 = vmatpush.msrb.mxu1 %v1175_v0  ;;  %v369_v29 = vadd.f32 %v368_v27, %v367_v25  ;;  %v376_v30 = vadd.f32 %v375_v28, %v374_v26 }
  0x51   : > { %735 = vmatpush.msrb.mxu2 %v1175_v0  ;;  %755 = vmatpush.msrb.mxu3 %v1175_v0 }
  0x52   : > { %696 = vmatpush.msrb.mxu0 %v1175_v0  ;;  %716 = vmatpush.msrb.mxu1 %v1175_v0  ;;  %v370_v31 = vrot.slane %v369_v29, 2  ;;  %v377_v32 = vrot.slane %v376_v30, 2 }
  0x53   : > { %736 = vmatpush.msrb.mxu2 %v1175_v0  ;;  %756 = vmatpush.msrb.mxu3 %v1175_v0 }
  0x54   : > { %697 = vmatpush.msrb.mxu0 %v1175_v0  ;;  %717 = vmatpush.msrb.mxu1 %v1175_v0  ;;  %v371_v33 = vadd.f32 %v370_v31, %v369_v29  ;;  %v378_v34 = vadd.f32 %v377_v32, %v376_v30 }
  0x55   : > { %737 = vmatpush.msrb.mxu2 %v1175_v0  ;;  %757 = vmatpush.msrb.mxu3 %v1175_v0 }
  0x56   : > { %698 = vmatpush.msrb.mxu0 %v1175_v0  ;;  %718 = vmatpush.msrb.mxu1 %v1175_v0  ;;  %v372_v35 = vrot.slane %v371_v33, 1  ;;  %v379_v36 = vrot.slane %v378_v34, 1 }
  0x57   : > { %738 = vmatpush.msrb.mxu2 %v1175_v0  ;;  %758 = vmatpush.msrb.mxu3 %v1175_v0 }
  0x58   : > { %699 = vmatpush.msrb.mxu0 %v1175_v0  ;;  %719 = vmatpush.msrb.mxu1 %v1175_v0  ;;  %v373_v37 = vadd.f32 %v372_v35, %v371_v33  ;;  %v380_v38 = vadd.f32 %v379_v36, %v378_v34 }
  0x59   : > { %739 = vmatpush.msrb.mxu2 %v1175_v0  ;;  %759 = vmatpush.msrb.mxu3 %v1175_v0 }
  0x5a   : > { %700 = vmatpush.msrb.mxu0 %v1175_v0  ;;  %720 = vmatpush.msrb.mxu1 %v1175_v0  ;;  %1051 = vrcp.f32 %v373_v37  ;;  %vm386_vm2 = vweird.f32 %v373_v37  ;;  %v390_v48 = vand.u32 2147483647, %v373_v37  ;;  %v392_v51 = vand.u32 2147483648, %v373_v37 }
  0x5b   : > { %740 = vmatpush.msrb.mxu2 %v1175_v0  ;;  %760 = vmatpush.msrb.mxu3 %v1175_v0  ;;  %1053 = vrcp.f32 %v380_v38  ;;  %v406_v52 = vand.u32 2147483648, %v380_v38  ;;  %vm400_vm4 = vweird.f32 %v380_v38  ;;  %v404_v54 = vand.u32 2147483647, %v380_v38 }
  0x5c   : > { %701 = vmatpush.msrb.mxu0 %v1175_v0  ;;  %721 = vmatpush.msrb.mxu1 %v1175_v0  ;;  %v393_v61 = vor.u32 1.1754944e-38, %v392_v51  ;;  %vm391_vm9 = vcmp.eq.f32.partialorder %v390_v48, 8.507059e+37  ;;  %1055 = vlog2.f32 %v373_v37 }
  0x5d   : > { %741 = vmatpush.msrb.mxu2 %v1175_v0  ;;  %761 = vmatpush.msrb.mxu3 %v1175_v0  ;;  %v407_v62 = vor.u32 1.1754944e-38, %v406_v52  ;;  %vm405_vm10 = vcmp.eq.f32.partialorder %v404_v54, 8.507059e+37  ;;  %1057 = vlog2.f32 %v380_v38 }
  0x5e   : > { %702 = vmatpush.msrb.mxu0 %v1175_v0  ;;  %722 = vmatpush.msrb.mxu1 %v1175_v0 }
  0x5f   : > { %742 = vmatpush.msrb.mxu2 %v1175_v0  ;;  %762 = vmatpush.msrb.mxu3 %v1175_v0 }
  0x60   : > { %703 = vmatpush.msrb.mxu0 %v1175_v0  ;;  %723 = vmatpush.msrb.mxu1 %v1175_v0  ;;  %v1052_v43 = vpop.eup %1051 }
  0x61   : > { %743 = vmatpush.msrb.mxu2 %v1175_v0  ;;  %763 = vmatpush.msrb.mxu3 %v1175_v0  ;;  %v1054_v44 = vpop.eup %1053  ;;  %v382_v46 = vmul.f32 %v1052_v43, %v373_v37  ;;  %vm387_vm3 = vweird.f32 %v1052_v43 }
  0x62   : > { %v396_v49 = vmul.f32 %v1054_v44, %v380_v38  ;;  %vm401_vm5 = vweird.f32 %v1054_v44  ;;  %vm1436_vm6 = vmor %vm386_vm2, %vm387_vm3  ;;  %v1056_v18 = vpop.eup %1055 }
  0x63   : > { %v383_v50 = vsub.f32 1.0, %v382_v46  ;;  %vm402_vm7 = vmor %vm400_vm4, %vm401_vm5  ;;  %v1058_v19 = vpop.eup %1057 }
  0x64   : > { %v397_v53 = vsub.f32 1.0, %v396_v49  ;;  %v418_v23 = vmul.f32 0.6931472, %v1058_v19 }
  0x65   : > { %v384_v55 = vmul.f32 %v1052_v43, %v383_v50 }
  0x66   : > { %v398_v57 = vmul.f32 %v1054_v44, %v397_v53  ;;  %v420_v25 = vadd.f32 %v418_v23, %v1346_v17 }
  0x67   : > { %v385_v60 = vadd.f32 %v1052_v43, %v384_v55 }
  0x68   : > { %v399_v63 = vadd.f32 %v1054_v44, %v398_v57 }
  0x69   : > { %v389_v0 = vsel %vm1436_vm6, %v1052_v43, %v385_v60 }
  0x6a   : > { %v403_v2 = vsel %vm402_vm7, %v1054_v44, %v399_v63  ;;  %v394_v5 = vsel %vm391_vm9, %v393_v61, %v389_v0 }
  0x6b   : > { %v408_v6 = vsel %vm405_vm10, %v407_v62, %v403_v2 }
  0x6c   : > { %v411_v7 = vrot.slane %v408_v6, 4 }
  0x6e   : > { %v412_v8 = vsel %vm338_vm0, %v394_v5, %v411_v7 }
  0x6f   : > { %v414_v10 = vmul.f32 %v1380_v22, %v412_v8  ;;  %v416_v22 = vmul.f32 0.6931472, %v1056_v18 }
  0x71   : > { %v587_v11 = vmul.f32 %v585_v9, %v414_v10  ;;  %v634_v12 = vadd.f32 %v585_v9, %v414_v10  ;;  %v419_v24 = vadd.f32 %v416_v22, %v1344_v16 }
  0x73   : > { %589 = vst [vmem:[#allocation1] ss:$2 sm:$0xff] %v587_v11 }
  0x7a   : > { %v590_v13 = vld.sshfl [vmem:[#allocation1] sm:$0xff pattern:$0x75316420]  ;;  %v591_v14 = vld.sshfl [vmem:[#allocation1 + $0x8] sm:$0xff pattern:$0x75316420] }
  0x7b   : > { %610 = vmatmul.f32.vlgmr.msra.gmra.mxu0 %v590_v13  ;;  %630 = vmatmul.f32.vlgmr.msra.gmra.mxu1 %v591_v14  ;;  %636 = vst [vmem:[#allocation1] ss:$2 sm:$0xff] %v634_v12 }
  0x82   : > { %v637_v20 = vld.sshfl [vmem:[#allocation1] sm:$0xff pattern:$0x75316420]  ;;  %v638_v21 = vld.sshfl [vmem:[#allocation1 + $0x8] sm:$0xff pattern:$0x75316420] }
  0x83   : > { %657 = vmatmul.f32.vlgmr.msra.gmra.mxu2 %v637_v20  ;;  %677 = vmatmul.f32.vlgmr.msra.gmra.mxu3 %v638_v21  ;;  %683 = vst [vmem:[#allocation1] ss:$2 sm:$0xff] %v681_v15 }
  0x8a   : > { %v684_v26 = vld.sshfl [vmem:[#allocation1] sm:$0xff pattern:$0x75316420]  ;;  %v685_v27 = vld.sshfl [vmem:[#allocation1 + $0x8] sm:$0xff pattern:$0x75316420] }
  0x8b   : > { %704 = vmatmul.f32.vlgmr.msrb.gmra.mxu0 %v684_v26  ;;  %724 = vmatmul.f32.vlgmr.msrb.gmra.mxu1 %v685_v27 }
  0x8c   : > { %744 = vmatmul.f32.vlgmr.msrb.gmra.mxu2 %v419_v24  ;;  %764 = vmatmul.f32.vlgmr.msrb.gmra.mxu3 %v420_v25 }
  0xf8   : > { %v611_v1 = vpop.f32.mrf.mxu0  ;;  %v631_v28 = vpop.f32.mrf.mxu1 }
  0xf9   : > { %v632_v16 = vadd.f32 %v631_v28, %v611_v1 }
  0xfb   : > { %777 = vst.msk [vmem:[%s306_s13] sm:$0xf] %vm768_vm11, %v632_v16 }
 0x106   : > { %v658_v17 = vpop.f32.mrf.mxu2  ;;  %v678_v29 = vpop.f32.mrf.mxu3 }
 0x107   : > { %v679_v30 = vadd.f32 %v678_v29, %v658_v17 }
 0x108   : > { %v705_v31 = vpop.f32.mrf.mxu0  ;;  %v725_v32 = vpop.f32.mrf.mxu1 }
 0x109   : > { %v726_v33 = vadd.f32 %v725_v32, %v705_v31  ;;  %778 = vst.msk [vmem:[%s313_s21] sm:$0xf] %vm768_vm11, %v679_v30 }
 0x10b   : > { %v769_v34 = vsel %vm768_vm11, %v726_v33, 0.0 }
 0x10c   : > { %v770_v35 = vrot.slane %v769_v34, 4 }
 0x10e   : > { %v771_v36 = vadd.f32 %v770_v35, %v769_v34 }
 0x10f   : > { %v745_v38 = vpop.f32.mrf.mxu2  ;;  %v765_v39 = vpop.f32.mrf.mxu3 }
 0x110   : > { %v772_v37 = vrot.slane %v771_v36, 2  ;;  %v766_v41 = vadd.f32 %v765_v39, %v745_v38 }
 0x112   : > { %v773_v40 = vadd.f32 %v772_v37, %v771_v36 }
 0x114   : > { %v774_v42 = vrot.slane %v773_v40, 1 }
 0x116   : > { %v775_v43 = vadd.f32 %v774_v42, %v773_v40 }
 0x118   : > { %v776_v44 = vsub.f32 %v766_v41, %v775_v43 }
 0x11a   : > { %780 = vst.msk [vmem:[%s319_s24] sm:$0x1] %vm779_vm12, %v776_v44 }
 0x11b PF: > { %s21_s20 = sadd.s32 1, %s1173_s20   ;;  %s1495_s15 = smov %s1157_s16 }
 0x11c   : > { %p18_p0 = scmp.ge.s32.totalorder %s21_s20, 4   ;;  %s1496_s16 = smov %s1161_s17 }
 0x11d   : > { %s1497_s17 = smov %s1251_s27  ;;  %s1498_s18 = smov %s1169_s19 }
 0x11e   : > { %s1499_s19 = smov %s1501_s22  ;;  %20 = sbr.rel (!%p18_p0) target bundleno = 6 (0x6), region = 105 }
 0x123   :  { %844 = vsyncpa [#allocation3], 1 }
 0x124   :  { %846 = vsyncpa [#allocation3 + $0x1], 1 }
 0x125   :  { %847 = vsyncpa [#allocation5], 1 }
 0x126   :  { %849 = vsyncpa [#allocation5 + $0x1], 1 }

</bundles_post_ra>
